<compile_context>
chip_gen: v6e
topology: v6e:2x2x1
jax: 0.10.0
libtpu: 0.0.40
codegen_flags: <defaults>
</compile_context>

<pallas_src>
import functools

import jax
import jax.numpy as jnp
from jax.experimental import pallas as pl
from jax.experimental.pallas import tpu as pltpu

BN_EPS = 1e-5
LEAKY_SLOPE = 0.2


def _round_up(v, m):
    return ((v + m - 1) // m) * m


def _vmem_capacity_bytes():
    try:
        return int(pltpu.get_tpu_info().vmem_capacity_bytes)
    except Exception:
        return 64 * 1024 * 1024  # worst-case per-TensorCore VMEM (v7x)


def _footprint_bytes(B, in_dim, hp, op, th, to, mm_bytes):
    # Double-buffered BlockSpec tiles + resident act cache (rough estimate,
    # before internal layout padding -- a 2x slack is added when setting the
    # compiler vmem limit).
    x_b = B * in_dim * mm_bytes
    w1_b = in_dim * th * mm_bytes
    gb_b = 2 * th * 4
    w2_b = th * to * mm_bytes
    out_b = B * to * 4
    act_b = B * hp * 4
    return 2 * (x_b + w1_b + gb_b + w2_b + out_b) + act_b


def _select_tiles(B, in_dim, hp, op, mm_bytes, budget):
    """Largest 128-multiple divisor tiles whose working set fits the budget.

    Max O tile first (avoids W1 re-stream / act recompute), then max H tile
    (fewest reduction steps).  For typical GEN sizes this returns (hp, op),
    i.e. a single grid step.
    """
    h_cands = [t for t in range(hp, 0, -128) if hp % t == 0]
    o_cands = [t for t in range(op, 0, -128) if op % t == 0]
    for to in o_cands:
        for th in h_cands:
            if _footprint_bytes(B, in_dim, hp, op, th, to, mm_bytes) <= budget:
                return th, to
    return 128, 128


def gen_forward_kernel(x_ref, w1_ref, gb_ref, w2_ref, out_ref, act_ref, *,
                       inv_b, th, matmul_dtype, cache_act):
    i = pl.program_id(0)  # output-feature tile ("parallel")
    j = pl.program_id(1)  # hidden reduction tile ("arbitrary", innermost)

    def compute_act():
        # Linear1 (bias dropped: exactly cancelled by BN1's batch-mean
        # subtraction under training-mode BatchNorm).  Single fused MXU push;
        # operands already in matmul_dtype, f32 accumulation.
        h = jnp.dot(x_ref[...], w1_ref[...], preferred_element_type=jnp.float32)
        # BatchNorm1d(hid_dim1): biased batch stats, per-feature -> exact per
        # H tile.  All element-wise math in f32.
        mean1 = jnp.sum(h, axis=0, keepdims=True) * inv_b
        c1 = h - mean1
        var1 = jnp.sum(c1 * c1, axis=0, keepdims=True) * inv_b
        hn = c1 * jax.lax.rsqrt(var1 + BN_EPS)
        hn = hn * gb_ref[0:1, :] + gb_ref[1:2, :]  # packed gamma / beta
        return jnp.where(hn > 0, hn, LEAKY_SLOPE * hn)  # LeakyReLU(0.2)

    @pl.when(j == 0)
    def _init():
        out_ref[...] = jnp.zeros_like(out_ref)

    if cache_act:
        # Multiple O tiles: compute Linear1/BN1/LeakyReLU only for the first O
        # tile and reuse the cached activations for the rest.
        h_off = pl.multiple_of(j * th, 128)

        @pl.when(i == 0)
        def _fill_cache():
            act_ref[:, pl.ds(h_off, th)] = compute_act()

        act = act_ref[:, pl.ds(h_off, th)]
    else:
        act = compute_act()

    # Linear2 tile (bias dropped, cancelled by BN2), accumulated directly into
    # the VMEM-resident output block (block index (0, i) is constant over j).
    out_ref[...] += jnp.dot(act.astype(matmul_dtype), w2_ref[...],
                            preferred_element_type=jnp.float32)

    @pl.when(j == pl.num_programs(1) - 1)
    def _finalize():
        # BatchNorm1d(ganout_dim, affine=False), training-mode stats, in place.
        o = out_ref[...]
        mean2 = jnp.sum(o, axis=0, keepdims=True) * inv_b
        c2 = o - mean2
        var2 = jnp.sum(c2 * c2, axis=0, keepdims=True) * inv_b
        out_ref[...] = c2 * jax.lax.rsqrt(var2 + BN_EPS)


def gen_forward(z, y, params, *, matmul_dtype=jnp.bfloat16,
                tile_h=None, tile_o=None):
    """GEN forward pass (training-mode BatchNorm) as one Pallas kernel.

    On v7x, pass tile_o = padded_out_dim // 2 to keep >= 2 blocks on the
    "parallel" O axis so the grid shards across both TensorCores (the act
    cache keeps the Linear1 recompute bounded in that case).
    """
    w1, _b1, g1, be1, w2, _b2 = params  # b1/b2: exact no-ops under training BN
    B, z_dim = z.shape
    _, y_dim = y.shape
    in_dim, hid = w1.shape
    hid2, out_dim = w2.shape
    assert in_dim == z_dim + y_dim and hid2 == hid

    # Lane-dense padding of both feature axes (padded H columns feed zero W2
    # rows -> contribute nothing; padded O columns are sliced off).  in_dim is
    # NOT padded: that would only inflate the streamed W1 bytes.
    hp = _round_up(hid, 128)
    op = _round_up(out_dim, 128)
    mm_bytes = jnp.dtype(matmul_dtype).itemsize

    # Concat once in the wrapper (a few KB) and pre-cast everything the MXU
    # touches to matmul_dtype (halves HBM weight bytes for bf16, no per-step
    # VPU casts).  gamma/beta stay f32 (BN math is f32).
    x = jnp.concatenate([z, y], axis=1).astype(matmul_dtype)
    w1p = jnp.pad(w1, ((0, 0), (0, hp - hid))).astype(matmul_dtype)
    w2p = jnp.pad(w2, ((0, hp - hid), (0, op - out_dim))).astype(matmul_dtype)
    gamma = jnp.pad(g1.reshape(1, hid), ((0, 0), (0, hp - hid)),
                    constant_values=1.0)
    beta = jnp.pad(be1.reshape(1, hid), ((0, 0), (0, hp - hid)))
    gb = jnp.concatenate([gamma, beta], axis=0)  # (2, hp) packed, f32

    cap = _vmem_capacity_bytes()
    th, to = _select_tiles(B, in_dim, hp, op, mm_bytes, budget=cap // 2)
    if tile_h is not None:
        th = tile_h
    if tile_o is not None:
        to = tile_o
    assert hp % th == 0 and op % to == 0 and th % 128 == 0 and to % 128 == 0
    n_o, n_h = op // to, hp // th
    grid = (n_o, n_h)  # reduction axis last
    cache_act = n_o > 1

    if cache_act:
        # For i > 0 park the W1 / gamma-beta block index at (0, 0): the tiles
        # are unused (act comes from the VMEM cache) so don't re-stream them.
        def w1_map(i, j):
            return (0, j * (1 - jnp.minimum(i, 1)))
        gb_map = w1_map
    else:
        def w1_map(i, j):
            return (0, j)
        gb_map = w1_map

    footprint = _footprint_bytes(B, in_dim, hp, op, th, to, mm_bytes)
    vmem_limit = int(min(cap, max(16 << 20, 2 * footprint + (2 << 20))))

    kernel = functools.partial(gen_forward_kernel, inv_b=1.0 / B, th=th,
                               matmul_dtype=matmul_dtype, cache_act=cache_act)

    out_padded = pl.pallas_call(
        kernel,
        out_shape=jax.ShapeDtypeStruct((B, op), jnp.float32),
        grid_spec=pltpu.PrefetchScalarGridSpec(
            num_scalar_prefetch=0,
            grid=grid,
            in_specs=[
                pl.BlockSpec((B, in_dim), lambda i, j: (0, 0)),
                pl.BlockSpec((in_dim, th), w1_map),
                pl.BlockSpec((2, th), gb_map),
                pl.BlockSpec((th, to), lambda i, j: (j, i)),
            ],
            out_specs=pl.BlockSpec((B, to), lambda i, j: (0, i)),
            scratch_shapes=[pltpu.VMEM((B, hp), jnp.float32)],  # act cache
        ),
        compiler_params=pltpu.CompilerParams(
            dimension_semantics=("parallel", "arbitrary"),
            vmem_limit_bytes=vmem_limit,
        ),
    )(x, w1p, gb, w2p)

    return out_padded[:, :out_dim]


def init_params(key, z_dim, y_dim, hid_dim1, ganout_dim):
    """Deterministic synthetic parameter init (PyTorch-style uniform ranges)."""
    in_dim = z_dim + y_dim
    k1, k2, k3, k4 = jax.random.split(key, 4)
    lim1 = 1.0 / jnp.sqrt(in_dim)
    lim2 = 1.0 / jnp.sqrt(hid_dim1)
    w1 = jax.random.uniform(k1, (in_dim, hid_dim1), jnp.float32, -lim1, lim1)
    b1 = jax.random.uniform(k2, (1, hid_dim1), jnp.float32, -lim1, lim1)
    g1 = jnp.ones((1, hid_dim1), jnp.float32)     # BN1 gamma
    be1 = jnp.zeros((1, hid_dim1), jnp.float32)   # BN1 beta
    w2 = jax.random.uniform(k3, (hid_dim1, ganout_dim), jnp.float32, -lim2, lim2)
    b2 = jax.random.uniform(k4, (1, ganout_dim), jnp.float32, -lim2, lim2)
    return (w1, b1, g1, be1, w2, b2)


def gen_forward_ref(z, y, params):
    """Pure-JAX reference matching the PyTorch module (biases included)."""
    w1, b1, g1, be1, w2, b2 = params
    x = jnp.concatenate([z, y], axis=1)
    h = x @ w1 + b1
    m = h.mean(0, keepdims=True)
    v = ((h - m) ** 2).mean(0, keepdims=True)
    h = (h - m) / jnp.sqrt(v + BN_EPS) * g1 + be1
    h = jnp.where(h > 0, h, LEAKY_SLOPE * h)
    o = h @ w2 + b2
    m2 = o.mean(0, keepdims=True)
    v2 = ((o - m2) ** 2).mean(0, keepdims=True)
    return (o - m2) / jnp.sqrt(v2 + BN_EPS)


if __name__ == "__main__":
    key = jax.random.PRNGKey(0)
    k1, k2, k3, k4, k5, k6 = jax.random.split(key, 6)

    # ---- Test 1: module-sized small shapes, f32 MXU operands, tight check.
    #      Auto-tiling collapses the grid to (1, 1).  Also verifies that
    #      dropping b1/b2 is exact (reference keeps them).
    B, z_dim, y_dim, hid_dim1, ganout_dim = 8, 16, 16, 32, 32
    z = jax.random.normal(k1, (B, z_dim), jnp.float32)
    y = jax.random.normal(k2, (B, y_dim), jnp.float32)
    params = init_params(k3, z_dim, y_dim, hid_dim1, ganout_dim)

    out = jax.block_until_ready(
        gen_forward(z, y, params, matmul_dtype=jnp.float32))
    ref = gen_forward_ref(z, y, params)
    assert out.shape == (B, ganout_dim)
    assert jnp.allclose(out, ref, atol=5e-4, rtol=5e-4), \
        float(jnp.max(jnp.abs(out - ref)))

    # ---- Test 2: forced multi-tile grid (2 O tiles x 2 H reduction tiles)
    #      exercising the act-cache / parked-W1 path, with the production bf16
    #      MXU path (BN / LeakyReLU math stays in f32).
    B2, zd2, yd2, hid2, out2_dim = 16, 40, 24, 256, 256
    zz = jax.random.normal(k4, (B2, zd2), jnp.float32)
    yy = jax.random.normal(k5, (B2, yd2), jnp.float32)
    params2 = init_params(k6, zd2, yd2, hid2, out2_dim)

    out2 = jax.block_until_ready(
        gen_forward(zz, yy, params2, matmul_dtype=jnp.bfloat16,
                    tile_h=128, tile_o=128))
    ref2 = gen_forward_ref(zz, yy, params2)
    assert out2.shape == (B2, out2_dim)
    assert jnp.allclose(out2, ref2, atol=5e-2, rtol=5e-2), \
        float(jnp.max(jnp.abs(out2 - ref2)))

    print("KERNEL_OK")
</pallas_src>

<mosaic_0001>
module attributes {stable_mosaic.version = 11 : i64} {
  func.func @gen_forward_kernel(%arg0: i32, %arg1: i32, %arg2: memref<8x32xf32, #tpu.memory_space<vmem>>, %arg3: memref<32x128xf32, #tpu.memory_space<vmem>>, %arg4: memref<2x128xf32, #tpu.memory_space<vmem>>, %arg5: memref<128x128xf32, #tpu.memory_space<vmem>>, %arg6: memref<8x128xf32, #tpu.memory_space<vmem>>, %arg7: memref<8x128xf32, #tpu.memory_space<vmem>>) attributes {dimension_semantics = [#tpu.dimension_semantics<parallel>, #tpu.dimension_semantics<arbitrary>], iteration_bounds = array<i64: 1, 1>, scalar_prefetch = 0 : i64, scratch_operands = 1 : i64, tpu.core_type = #tpu.core_type<tc>, window_params = [{pipeline_mode = #tpu.pipeline_mode<synchronous>, transform_indices = @transform_0, window_bounds = array<i64: 8, 32>}, {transform_indices = @transform_1, window_bounds = array<i64: 32, 128>}, {transform_indices = @transform_2, window_bounds = array<i64: 2, 128>}, {transform_indices = @transform_3, window_bounds = array<i64: 128, 128>}, {transform_indices = @transform_4, window_bounds = array<i64: 8, 128>}]} {
    %c0_i32 = arith.constant 0 : i32
    %0 = arith.cmpi eq, %arg1, %c0_i32 : i32
    %1 = arith.extui %0 : i1 to i32
    %c0_i32_0 = arith.constant 0 : i32
    %2 = arith.cmpi ne, %1, %c0_i32_0 : i32
    scf.if %2 {
      %cst_23 = arith.constant 0.000000e+00 : f32
      %41 = vector.broadcast %cst_23 : f32 to vector<8x128xf32>
      %c0_24 = arith.constant 0 : index
      %c0_25 = arith.constant 0 : index
      %42 = vector.load %arg6[%c0_24, %c0_25] : memref<8x128xf32, #tpu.memory_space<vmem>>, vector<8x128xf32>
      tpu.vector_store %arg6[%c0_24, %c0_25], %41 {strides = array<i32>} : memref<8x128xf32, #tpu.memory_space<vmem>>, vector<8x128xf32>,
    } else {
    }
    %c0 = arith.constant 0 : index
    %c0_1 = arith.constant 0 : index
    %3 = vector.load %arg2[%c0, %c0_1] : memref<8x32xf32, #tpu.memory_space<vmem>>, vector<8x32xf32>
    %c0_2 = arith.constant 0 : index
    %c0_3 = arith.constant 0 : index
    %4 = vector.load %arg3[%c0_2, %c0_3] : memref<32x128xf32, #tpu.memory_space<vmem>>, vector<32x128xf32>
    %cst = arith.constant dense<0.000000e+00> : vector<8x128xf32>
    %5 = tpu.matmul %3, %4, %cst {dimension_numbers = #tpu.dot_dimension_numbers<[1], [0], [0], [1], [0, 0, 1, 1], [], []>} : vector<8x32xf32>, vector<32x128xf32>, vector<8x128xf32> -> vector<8x128xf32>
    %cst_4 = arith.constant dense<0.000000e+00> : vector<128xf32>
    %6 = vector.multi_reduction <add>, %5, %cst_4 [0] : vector<8x128xf32> to vector<128xf32>
    %7 = vector.shape_cast %6 : vector<128xf32> to vector<1x128xf32>
    %cst_5 = arith.constant 1.250000e-01 : f32
    %8 = vector.broadcast %cst_5 : f32 to vector<1x128xf32>
    %9 = arith.mulf %7, %8 : vector<1x128xf32>
    %10 = vector.broadcast %9 : vector<1x128xf32> to vector<8x128xf32>
    %11 = arith.subf %5, %10 : vector<8x128xf32>
    %12 = arith.mulf %11, %11 : vector<8x128xf32>
    %cst_6 = arith.constant dense<0.000000e+00> : vector<128xf32>
    %13 = vector.multi_reduction <add>, %12, %cst_6 [0] : vector<8x128xf32> to vector<128xf32>
    %14 = vector.shape_cast %13 : vector<128xf32> to vector<1x128xf32>
    %cst_7 = arith.constant 1.250000e-01 : f32
    %15 = vector.broadcast %cst_7 : f32 to vector<1x128xf32>
    %16 = arith.mulf %14, %15 : vector<1x128xf32>
    %cst_8 = arith.constant 9.99999974E-6 : f32
    %17 = vector.broadcast %cst_8 : f32 to vector<1x128xf32>
    %18 = arith.addf %16, %17 : vector<1x128xf32>
    %19 = math.rsqrt %18 : vector<1x128xf32>
    %20 = vector.broadcast %19 : vector<1x128xf32> to vector<8x128xf32>
    %21 = arith.mulf %11, %20 : vector<8x128xf32>
    %c0_9 = arith.constant 0 : index
    %c0_10 = arith.constant 0 : index
    %22 = vector.load %arg4[%c0_9, %c0_10] : memref<2x128xf32, #tpu.memory_space<vmem>>, vector<1x128xf32>
    %23 = vector.broadcast %22 : vector<1x128xf32> to vector<8x128xf32>
    %24 = arith.mulf %21, %23 : vector<8x128xf32>
    %c1 = arith.constant 1 : index
    %c0_11 = arith.constant 0 : index
    %25 = vector.load %arg4[%c1, %c0_11] : memref<2x128xf32, #tpu.memory_space<vmem>>, vector<1x128xf32>
    %26 = vector.broadcast %25 : vector<1x128xf32> to vector<8x128xf32>
    %27 = arith.addf %24, %26 : vector<8x128xf32>
    %cst_12 = arith.constant 0.000000e+00 : f32
    %28 = vector.broadcast %cst_12 : f32 to vector<8x128xf32>
    %29 = arith.cmpf ogt, %27, %28 : vector<8x128xf32>
    %cst_13 = arith.constant 2.000000e-01 : f32
    %30 = vector.broadcast %cst_13 : f32 to vector<8x128xf32>
    %31 = arith.mulf %30, %27 : vector<8x128xf32>
    %32 = arith.select %29, %27, %31 : vector<8x128xi1>, vector<8x128xf32>
    %c0_14 = arith.constant 0 : index
    %c0_15 = arith.constant 0 : index
    %33 = vector.load %arg6[%c0_14, %c0_15] : memref<8x128xf32, #tpu.memory_space<vmem>>, vector<8x128xf32>
    %c0_16 = arith.constant 0 : index
    %c0_17 = arith.constant 0 : index
    %34 = vector.load %arg5[%c0_16, %c0_17] : memref<128x128xf32, #tpu.memory_space<vmem>>, vector<128x128xf32>
    %cst_18 = arith.constant dense<0.000000e+00> : vector<8x128xf32>
    %35 = tpu.matmul %32, %34, %cst_18 {dimension_numbers = #tpu.dot_dimension_numbers<[1], [0], [0], [1], [0, 0, 1, 1], [], []>} : vector<8x128xf32>, vector<128x128xf32>, vector<8x128xf32> -> vector<8x128xf32>
    %36 = arith.addf %33, %35 : vector<8x128xf32>
    %c0_19 = arith.constant 0 : index
    %c0_20 = arith.constant 0 : index
    %37 = vector.load %arg6[%c0_19, %c0_20] : memref<8x128xf32, #tpu.memory_space<vmem>>, vector<8x128xf32>
    tpu.vector_store %arg6[%c0_19, %c0_20], %36 {strides = array<i32>} : memref<8x128xf32, #tpu.memory_space<vmem>>, vector<8x128xf32>,
    %c0_i32_21 = arith.constant 0 : i32
    %38 = arith.cmpi eq, %arg1, %c0_i32_21 : i32
    %39 = arith.extui %38 : i1 to i32
    %c0_i32_22 = arith.constant 0 : i32
    %40 = arith.cmpi ne, %39, %c0_i32_22 : i32
    scf.if %40 {
      %c0_23 = arith.constant 0 : index
      %c0_24 = arith.constant 0 : index
      %41 = vector.load %arg6[%c0_23, %c0_24] : memref<8x128xf32, #tpu.memory_space<vmem>>, vector<8x128xf32>
      %cst_25 = arith.constant dense<0.000000e+00> : vector<128xf32>
      %42 = vector.multi_reduction <add>, %41, %cst_25 [0] : vector<8x128xf32> to vector<128xf32>
      %43 = vector.shape_cast %42 : vector<128xf32> to vector<1x128xf32>
      %cst_26 = arith.constant 1.250000e-01 : f32
      %44 = vector.broadcast %cst_26 : f32 to vector<1x128xf32>
      %45 = arith.mulf %43, %44 : vector<1x128xf32>
      %46 = vector.broadcast %45 : vector<1x128xf32> to vector<8x128xf32>
      %47 = arith.subf %41, %46 : vector<8x128xf32>
      %48 = arith.mulf %47, %47 : vector<8x128xf32>
      %cst_27 = arith.constant dense<0.000000e+00> : vector<128xf32>
      %49 = vector.multi_reduction <add>, %48, %cst_27 [0] : vector<8x128xf32> to vector<128xf32>
      %50 = vector.shape_cast %49 : vector<128xf32> to vector<1x128xf32>
      %cst_28 = arith.constant 1.250000e-01 : f32
      %51 = vector.broadcast %cst_28 : f32 to vector<1x128xf32>
      %52 = arith.mulf %50, %51 : vector<1x128xf32>
      %cst_29 = arith.constant 9.99999974E-6 : f32
      %53 = vector.broadcast %cst_29 : f32 to vector<1x128xf32>
      %54 = arith.addf %52, %53 : vector<1x128xf32>
      %55 = math.rsqrt %54 : vector<1x128xf32>
      %56 = vector.broadcast %55 : vector<1x128xf32> to vector<8x128xf32>
      %57 = arith.mulf %47, %56 : vector<8x128xf32>
      %c0_30 = arith.constant 0 : index
      %c0_31 = arith.constant 0 : index
      %58 = vector.load %arg6[%c0_30, %c0_31] : memref<8x128xf32, #tpu.memory_space<vmem>>, vector<8x128xf32>
      tpu.vector_store %arg6[%c0_30, %c0_31], %57 {strides = array<i32>} : memref<8x128xf32, #tpu.memory_space<vmem>>, vector<8x128xf32>,
    } else {
    }
    return
  }
  func.func @transform_0(%arg0: i32, %arg1: i32) -> (i32, i32) {
    %c0_i32 = arith.constant 0 : i32
    %c0_i32_0 = arith.constant 0 : i32
    %c0_i32_1 = arith.constant 0 : i32
    return %c0_i32, %c0_i32_0 : i32, i32
  }
  func.func @transform_1(%arg0: i32, %arg1: i32) -> (i32, i32) {
    %c0_i32 = arith.constant 0 : i32
    %c0_i32_0 = arith.constant 0 : i32
    return %c0_i32, %arg1 : i32, i32
  }
  func.func @transform_2(%arg0: i32, %arg1: i32) -> (i32, i32) {
    %c0_i32 = arith.constant 0 : i32
    %c0_i32_0 = arith.constant 0 : i32
    return %c0_i32, %arg1 : i32, i32
  }
  func.func @transform_3(%arg0: i32, %arg1: i32) -> (i32, i32) {
    %c0_i32 = arith.constant 0 : i32
    return %arg1, %arg0 : i32, i32
  }
  func.func @transform_4(%arg0: i32, %arg1: i32) -> (i32, i32) {
    %c0_i32 = arith.constant 0 : i32
    %c0_i32_0 = arith.constant 0 : i32
    return %c0_i32, %arg0 : i32, i32
  }
}

</mosaic_0001>

<bundles_post_ra>
// kernel: tpu_custom_call.1
= control target key start
LH: loop header
LB: loop body
LE: loop exit
PB: predicated region body
PF: predicated region fallthrough
CT: control target
= control target key end

     0   :  { %9 = vsyncpa [#allocation4], 0  ;;  %s546_s0 = inlined_call_operand.hbm [shape: f32[8,32], index: 0, kind: input, shape index: {}]   ;;  %s547_s1 = inlined_call_operand.hbm [shape: f32[32,128], index: 1, kind: input, shape index: {}]   ;;  %s548_s2 = inlined_call_operand.vmem [shape: f32[2,128], index: 2, kind: input, shape index: {}]   ;;  %s549_s3 = inlined_call_operand.hbm [shape: f32[128,128], index: 3, kind: input, shape index: {}]   ;;  %s550_s4 = inlined_call_operand.hbm [shape: f32[8,128], index: 4, kind: output, shape index: {}]  }
   0x1   :  { %10 = vsyncpa [#allocation7], 0 }
   0x2   :  { %11 = vsyncpa [#allocation5], 0  ;;  %s473_s15 = smov [#allocation6]  }
   0x3   :  { %s27_s16 = sshll.u32 %s473_s15, 4  ;;  %s28_s16 = int_to_ptr.vmem [resolvable:$true] %s27_s16 }
   0x4   :  { %s395_s17 = scalar_lea.vmem %s28_s16, 512  ;;  %p400_p1 = scmp.lt.s32.totalorder %s28_s16, %s28_s16 }
   0x5   :  { %p396_p0 = scmp.ne.s32.totalorder %s28_s16, %s395_s17  ;;  %p401_p2 = scmp.lt.s32.totalorder %s395_s17, %s395_s17 }
   0x7   :  { %p402_p3 = por %p401_p2, %p400_p1 }
   0x9   :  { %p403_p4 = pnand %p402_p3, %p396_p0 }
   0xb   :  { %406 = shalt.err (!%p403_p4)
}
   0xc   :  { %s474_s18 = smov 128   ;;  %s475_s19 = smov 8  }
   0xd   :  { %33 = dma.hbm_to_vmem [thread:$0]  %s547_s1, 512, %s28_s16, [#allocation7], %s474_s18, %s474_s18, %s475_s19  }
   0xe   :  { %s476_s22 = smov [#allocation3]   ;;  %s477_s24 = smov [#allocation8]  }
   0xf   :  { %s18_s23 = sshll.u32 %s476_s22, 4  ;;  %s41_s25 = sshll.u32 %s477_s24, 4  ;;  %s19_s23 = int_to_ptr.vmem [resolvable:$true] %s18_s23  ;;  %s42_s25 = int_to_ptr.vmem [resolvable:$true] %s41_s25 }
  0x10   :  { %s415_s26 = scalar_lea.vmem %s19_s23, 128  ;;  %p420_p6 = scmp.lt.s32.totalorder %s19_s23, %s19_s23 }
  0x11   :  { %p416_p5 = scmp.ne.s32.totalorder %s19_s23, %s415_s26  ;;  %p421_p7 = scmp.lt.s32.totalorder %s415_s26, %s415_s26 }
  0x13   :  { %p422_p8 = por %p421_p7, %p420_p6 }
  0x15   :  { %p423_p9 = pnand %p422_p8, %p416_p5 }
  0x17   :  { %426 = shalt.err (!%p423_p9)
}
  0x18   :  { %21 = dma.hbm_to_vmem [thread:$0]  %s546_s0, 128, %s19_s23, [#allocation4]  }
  0x19   :  { %s435_s29 = scalar_lea.vmem %s42_s25, 2048  ;;  %p440_p11 = scmp.lt.s32.totalorder %s42_s25, %s42_s25 }
  0x1a   :  { %p436_p10 = scmp.ne.s32.totalorder %s42_s25, %s435_s29  ;;  %p441_p12 = scmp.lt.s32.totalorder %s435_s29, %s435_s29 }
  0x1c   :  { %p442_p13 = por %p441_p12, %p440_p11 }
  0x1e   :  { %p443_p0 = pnand %p442_p13, %p436_p10 }
  0x20   :  { %446 = shalt.err (!%p443_p0)
}
  0x21   :  { %47 = dma.hbm_to_vmem [thread:$0]  %s549_s3, 2048, %s42_s25, [#allocation7], %s474_s18, %s474_s18, %s475_s19  }
  0x22   :  { %467 = dma.done.wait [#allocation4], 128  }
  0x23   :  { %468 = vsyncadd [#allocation4], 4294967168 }
  0x24   :  { %469 = dma.done.wait [#allocation7], 2560  }
  0x25   :  { %470 = vsyncadd [#allocation7], 4294964736  ;;  %v478_v0 = vmov 0.0   ;;  %vm479_vm0 = vmmov 0   ;;  %v66_v1 = vld [vmem:[#allocation6 + $0x18] sm:$0xff]  ;;  %v65_v2 = vld [vmem:[#allocation6 + $0x10] sm:$0xff] }
  0x26   :  { %329 = vmatprep.subr.mxu0 %v478_v0  ;;  %337 = vmatprep.mubr.msk.f32.mxu0 %vm479_vm0, %v478_v0  ;;  %v64_v3 = vld [vmem:[#allocation6 + $0x8] sm:$0xff]  ;;  %v63_v4 = vld [vmem:[#allocation6] sm:$0xff]  ;;  %v62_v5 = vld [vmem:[#allocation3] sm:$0xff]  ;;  %vm67_vm1 = vcmask 261120  }
  0x27   :  { %340 = vmatprep.subr.mxu1 %v478_v0  ;;  %372 = vmatprep.mubr.msk.f32.mxu1 %vm479_vm0, %v478_v0  ;;  %v191_v6 = vld [vmem:[#allocation8 + $0x78] sm:$0xff]  ;;  %v190_v7 = vld [vmem:[#allocation8 + $0x70] sm:$0xff]  ;;  %v189_v8 = vld [vmem:[#allocation8 + $0x68] sm:$0xff] }
  0x28   :  { %330 = vmatpush3.msra.mxu0 %v66_v1  ;;  %341 = vmatpush3.msra.mxu1 %v191_v6  ;;  %v188_v9 = vld [vmem:[#allocation8 + $0x60] sm:$0xff]  ;;  %v187_v10 = vld [vmem:[#allocation8 + $0x58] sm:$0xff]  ;;  %v186_v11 = vld [vmem:[#allocation8 + $0x50] sm:$0xff] }
  0x29   :  { %331 = vmatprep.subr.mxu0 %v478_v0  ;;  %342 = vmatprep.subr.mxu1 %v478_v0  ;;  %v185_v12 = vld [vmem:[#allocation8 + $0x48] sm:$0xff]  ;;  %v184_v13 = vld [vmem:[#allocation8 + $0x40] sm:$0xff]  ;;  %v183_v14 = vld [vmem:[#allocation8 + $0x38] sm:$0xff] }
  0x2a   :  { %332 = vmatpush3.msra.mxu0 %v65_v2  ;;  %343 = vmatpush3.msra.mxu1 %v190_v7  ;;  %v182_v15 = vld [vmem:[#allocation8 + $0x30] sm:$0xff]  ;;  %v181_v16 = vld [vmem:[#allocation8 + $0x28] sm:$0xff]  ;;  %v180_v17 = vld [vmem:[#allocation8 + $0x20] sm:$0xff] }
  0x2b   :  { %333 = vmatprep.subr.mxu0 %v478_v0  ;;  %344 = vmatprep.subr.mxu1 %v478_v0  ;;  %v179_v18 = vld [vmem:[#allocation8 + $0x18] sm:$0xff]  ;;  %v178_v19 = vld [vmem:[#allocation8 + $0x10] sm:$0xff]  ;;  %v177_v20 = vld [vmem:[#allocation8 + $0x8] sm:$0xff] }
  0x2c   :  { %334 = vmatpush3.msra.mxu0 %v64_v3  ;;  %345 = vmatpush3.msra.mxu1 %v189_v8  ;;  %v176_v21 = vld [vmem:[#allocation8] sm:$0xff]  ;;  %v305_v42 = vld [vmem:[%s548_s2] ss:$0 sm:$0xff]  ;;  %v306_v44 = vld [vmem:[%s548_s2 + $0x1] ss:$0 sm:$0xff]  ;;  %s480_s2 = smov [#allocation9]  }
  0x2d   :  { %335 = vmatprep.subr.mxu0 %v478_v0  ;;  %346 = vmatprep.subr.mxu1 %v478_v0  ;;  %s294_s7 = sshll.u32 %s480_s2, 4  ;;  %s295_s7 = int_to_ptr.vmem [resolvable:$true] %s294_s7 }
  0x2e   :  { %336 = vmatpush3.msra.mxu0 %v63_v4  ;;  %347 = vmatpush3.msra.mxu1 %v188_v9  ;;  %s447_s8 = scalar_lea.vmem %s295_s7, 128  ;;  %p452_p2 = scmp.lt.s32.totalorder %s295_s7, %s295_s7 }
  0x2f   :  { %338 = vmatmul.mubr.msk.f32.vlgmr.msra.gmra.mxu0 %vm67_vm1, %v62_v5  ;;  %348 = vmatprep.subr.mxu1 %v478_v0  ;;  %p448_p1 = scmp.ne.s32.totalorder %s295_s7, %s447_s8  ;;  %p453_p3 = scmp.lt.s32.totalorder %s447_s8, %s447_s8 }
  0x30   :  { %349 = vmatpush3.msra.mxu1 %v187_v10 }
  0x31   :  { %350 = vmatprep.subr.mxu1 %v478_v0  ;;  %p454_p4 = por %p453_p3, %p452_p2 }
  0x32   :  { %351 = vmatpush3.msra.mxu1 %v186_v11 }
  0x33   :  { %352 = vmatprep.subr.mxu1 %v478_v0  ;;  %p455_p5 = pnand %p454_p4, %p448_p1 }
  0x34   :  { %353 = vmatpush3.msra.mxu1 %v185_v12 }
  0x35   :  { %354 = vmatprep.subr.mxu1 %v478_v0 }
  0x36   :  { %355 = vmatpush3.msra.mxu1 %v184_v13 }
  0x37   :  { %356 = vmatprep.subr.mxu1 %v478_v0 }
  0x38   :  { %357 = vmatpush3.msra.mxu1 %v183_v14 }
  0x39   :  { %358 = vmatprep.subr.mxu1 %v478_v0 }
  0x3a   :  { %359 = vmatpush3.msra.mxu1 %v182_v15 }
  0x3b   :  { %360 = vmatprep.subr.mxu1 %v478_v0 }
  0x3c   :  { %361 = vmatpush3.msra.mxu1 %v181_v16 }
  0x3d   :  { %362 = vmatprep.subr.mxu1 %v478_v0 }
  0x3e   :  { %363 = vmatpush3.msra.mxu1 %v180_v17 }
  0x3f   :  { %364 = vmatprep.subr.mxu1 %v478_v0 }
  0x40   :  { %365 = vmatpush3.msra.mxu1 %v179_v18 }
  0x41   :  { %366 = vmatprep.subr.mxu1 %v478_v0 }
  0x42   :  { %367 = vmatpush3.msra.mxu1 %v178_v19 }
  0x43   :  { %368 = vmatprep.subr.mxu1 %v478_v0 }
  0x44   :  { %369 = vmatpush3.msra.mxu1 %v177_v20 }
  0x45   :  { %370 = vmatprep.subr.mxu1 %v478_v0 }
  0x46   :  { %371 = vmatpush3.msra.mxu1 %v176_v21 }
  0xef   :  { %v137_v22 = vpop.f32.mrf.mxu0 }
  0xf0   :  { %v141_v23 = vrot.slane %v137_v22, 4 }
  0xf1   :  { %v339_v24 = vpop.f32.mrf.mxu0 }
  0xf2   :  { %v142_v25 = vadd.f32 %v141_v23, %v137_v22 }
  0xf4   :  { %v143_v26 = vrot.slane %v142_v25, 2 }
  0xf6   :  { %v144_v27 = vadd.f32 %v143_v26, %v142_v25 }
  0xf8   :  { %v145_v28 = vrot.slane %v144_v27, 1 }
  0xfa   :  { %v146_v29 = vadd.f32 %v145_v28, %v144_v27 }
  0xfc   :  { %v147_v30 = vmul.f32 0.125, %v146_v29 }
  0xfe   :  { %v148_v31 = vsub.f32 %v137_v22, %v147_v30 }
 0x100   :  { %v149_v32 = vmul.f32 %v148_v31, %v148_v31 }
 0x102   :  { %v150_v33 = vrot.slane %v149_v32, 4 }
 0x104   :  { %v151_v34 = vadd.f32 %v150_v33, %v149_v32 }
 0x106   :  { %v152_v35 = vrot.slane %v151_v34, 2 }
 0x108   :  { %v153_v36 = vadd.f32 %v152_v35, %v151_v34 }
 0x10a   :  { %v154_v37 = vrot.slane %v153_v36, 1 }
 0x10c   :  { %v155_v38 = vadd.f32 %v154_v37, %v153_v36 }
 0x10e   :  { %v156_v39 = vmul.f32 0.125, %v155_v38 }
 0x110   :  { %v157_v40 = vadd.f32 1e-05, %v156_v39 }
 0x112   :  { %383 = vrsqrt.f32 %v157_v40 }
 0x11f   :  { %v384_v41 = vpop.eup %383 }
 0x120   :  { %v159_v43 = vmul.f32 %v384_v41, %v148_v31 }
 0x122   :  { %v165_v45 = vmul.f32 %v305_v42, %v159_v43 }
 0x124   :  { %v171_v46 = vadd.f32 %v306_v44, %v165_v45 }
 0x126   :  { %vm172_vm2 = vcmp.gt.f32.partialorder %v171_v46, 0.0  ;;  %v173_v47 = vmul.f32 0.2, %v171_v46 }
 0x128   :  { %v174_v48 = vsel %vm172_vm2, %v171_v46, %v173_v47 }
 0x129   :  { %373 = vmatmul.mubr.f32.vlgmr.msra.gmra.mxu1 %v174_v48 }
 0x1e9   :  { %v258_v49 = vpop.f32.mrf.mxu1 }
 0x1ea   :  { %v268_v51 = vrot.slane %v258_v49, 4 }
 0x1eb   :  { %v374_v50 = vpop.f32.mrf.mxu1 }
 0x1ec   :  { %v269_v52 = vadd.f32 %v268_v51, %v258_v49 }
 0x1ee   :  { %v270_v53 = vrot.slane %v269_v52, 2 }
 0x1f0   :  { %v271_v54 = vadd.f32 %v270_v53, %v269_v52 }
 0x1f2   :  { %v272_v55 = vrot.slane %v271_v54, 1 }
 0x1f4   :  { %v273_v56 = vadd.f32 %v272_v55, %v271_v54 }
 0x1f6   :  { %v274_v57 = vmul.f32 0.125, %v273_v56 }
 0x1f8   :  { %v275_v58 = vsub.f32 %v258_v49, %v274_v57 }
 0x1fa   :  { %v276_v59 = vmul.f32 %v275_v58, %v275_v58 }
 0x1fc   :  { %v277_v60 = vrot.slane %v276_v59, 4 }
 0x1fe   :  { %v278_v61 = vadd.f32 %v277_v60, %v276_v59 }
 0x200   :  { %v279_v62 = vrot.slane %v278_v61, 2 }
 0x202   :  { %v280_v63 = vadd.f32 %v279_v62, %v278_v61 }
 0x204   :  { %v281_v0 = vrot.slane %v280_v63, 1 }
 0x206   :  { %v282_v1 = vadd.f32 %v281_v0, %v280_v63 }
 0x208   :  { %v283_v2 = vmul.f32 0.125, %v282_v1 }
 0x20a   :  { %v284_v3 = vadd.f32 1e-05, %v283_v2 }
 0x20c   :  { %385 = vrsqrt.f32 %v284_v3 }
 0x219   :  { %v386_v4 = vpop.eup %385 }
 0x21a   :  { %v286_v5 = vmul.f32 %v386_v4, %v275_v58 }
 0x21c   :  { %287 = vst [vmem:[#allocation9] sm:$0xff] %v286_v5 }
 0x21d   :  { %458 = shalt.err (!%p455_p5)
}
 0x21e   :  { %297 = dma.vmem_to_hbm [thread:$0]  %s295_s7, 128, %s550_s4, [#allocation5]  }
 0x21f   :  { %471 = dma.done.wait [#allocation5], 128  }
 0x220   :  { %472 = vsyncadd [#allocation5], 4294967168 }
 0x221   :  { %301 = vsyncpa [#allocation4], 1 }
 0x222   :  { %302 = vsyncpa [#allocation7], 1 }
 0x223   :  { %303 = vsyncpa [#allocation5], 1 }

</bundles_post_ra>
